<compile_context>
chip_gen: v7x
topology: tpu7x:2x2x1
jax: 0.10.0
libtpu: 0.0.40
codegen_flags: <defaults>
</compile_context>

<pallas_src>
import functools

import numpy as np
import jax
import jax.numpy as jnp
from jax import lax
from jax.experimental import pallas as pl
from jax.experimental.pallas import tpu as pltpu


_LANE = 128


def _round_up(v, m):
    return ((v + m - 1) // m) * m


# ---------------------------------------------------------------------------
# Kernel: one grid step == one independent (N, L) instance.
# ---------------------------------------------------------------------------
def _magnitude_scaling_kernel(x_ref, wf_ref, wit_ref, wib_ref, mask_ref,
                              out_ref, *, lower_value, upper_value, lp):
    # ---- forward DFT: one fused MXU matmul -> [re | im] (lane-padded) ------
    x16 = x_ref[0].astype(jnp.bfloat16)                          # (N, L)
    fwd = jnp.dot(x16, wf_ref[...],
                  preferred_element_type=jnp.float32)            # (N, 2*Lp) f32
    re = fwd[:, :lp]                                             # lane-aligned
    im = fwd[:, lp:]

    # ---- |fft| + per-column min-max rescale (f32; rsqrt/recip on the EUP) --
    sq = re * re + im * im
    zero = sq == 0.0
    inv_mag = lax.rsqrt(jnp.where(zero, 1.0, sq))                # EUP slot
    mag = sq * inv_mag                                           # == |fft(x)|

    col_min = jnp.min(mag, axis=0, keepdims=True)                # (1, Lp)
    col_max = jnp.max(mag, axis=0, keepdims=True)
    rng = col_max - col_min
    # Guard degenerate columns (col_max == col_min, incl. the zero-padded
    # frequency lanes): torch divides by zero there (NaN); we map the column
    # to lower_value instead so nothing non-finite leaks into the iDFT.
    inv_rng = pl.reciprocal(jnp.where(rng == 0.0, 1.0, rng), approx=True)
    scaled = ((upper_value - lower_value) * (mag - col_min) * inv_rng
              + lower_value)

    mask = mask_ref[...]                                         # (1, Lp)
    new_mag = jnp.where(mask > 0.0, scaled, mag)

    # torch.polar(new_mag, angle(old)) == (new_mag / |old|) * old, with the
    # |old| == 0 corner matching torch (angle(0) == 0 -> new_mag + 0j).
    ratio = new_mag * inv_mag
    re2 = jnp.where(zero, new_mag, ratio * re)
    im2 = jnp.where(zero, 0.0, ratio * im)

    # ---- inverse DFT: split-dot form (no concat / extra VMEM slab) ---------
    #   [re_out | im_out] = re2 @ [C | S]/L + im2 @ [-S | C]/L
    out_ref[0] = (
        jnp.dot(re2.astype(jnp.bfloat16), wit_ref[...],
                preferred_element_type=jnp.float32)
        + jnp.dot(im2.astype(jnp.bfloat16), wib_ref[...],
                  preferred_element_type=jnp.float32))           # (N, 2*Lp)


# ---------------------------------------------------------------------------
# Host-side helpers (cached).
# ---------------------------------------------------------------------------
@functools.lru_cache(maxsize=8)
def _dft_weights(length):
    """Fused bf16 DFT weights, frequency axis zero-padded to 128 lanes."""
    L = length
    Lp = _round_up(L, _LANE)
    n = np.arange(L)
    ang = 2.0 * np.pi * np.outer(n, n) / float(L)
    c = np.cos(ang)
    s = np.sin(ang)

    w_fwd = np.zeros((L, 2 * Lp), np.float32)                    # x @ W_fwd
    w_fwd[:, :L] = c
    w_fwd[:, Lp:Lp + L] = -s

    w_inv_top = np.zeros((Lp, 2 * Lp), np.float32)               # re2 @ [C|S]/L
    w_inv_top[:L, :L] = c / L
    w_inv_top[:L, Lp:Lp + L] = s / L

    w_inv_bot = np.zeros((Lp, 2 * Lp), np.float32)               # im2 @ [-S|C]/L
    w_inv_bot[:L, :L] = -s / L
    w_inv_bot[:L, Lp:Lp + L] = c / L

    return (jnp.asarray(w_fwd, jnp.bfloat16),
            jnp.asarray(w_inv_top, jnp.bfloat16),
            jnp.asarray(w_inv_bot, jnp.bfloat16))


@functools.lru_cache(maxsize=1)
def _single_buffer_supported():
    """Probe once whether this jax build accepts pl.Buffered(1) on an input."""
    def _copy(x_ref, o_ref):
        o_ref[...] = x_ref[...]
    try:
        spec = pl.BlockSpec((8, _LANE), lambda i: (0, 0),
                            pipeline_mode=pl.Buffered(1))
        out = pl.pallas_call(
            _copy,
            out_shape=jax.ShapeDtypeStruct((8, _LANE), jnp.float32),
            grid=(1,),
            in_specs=[spec],
            out_specs=pl.BlockSpec((8, _LANE), lambda i: (0, 0)),
        )(jnp.zeros((8, _LANE), jnp.float32))
        jax.block_until_ready(out)
        return True
    except Exception:
        return False


def _vmem_limit_bytes(n, length, lp):
    """Per-generation VMEM cap (don't clamp v5e/v6e 128 MiB down to 64)."""
    try:
        cap = int(pltpu.get_tpu_info().vmem_capacity_bytes)
    except Exception:
        cap = 64 << 20                                            # conservative
    cap = max(cap - (8 << 20), 32 << 20)                          # headroom

    weight_bytes = (length * 2 * lp + 2 * lp * 2 * lp) * 2 + lp * 4
    io_bytes = 2 * (n * length * 4) + 2 * (n * 2 * lp * 4)        # dbl-buffered
    tmp_bytes = 12 * n * lp * 4                                   # temporaries
    needed = weight_bytes + io_bytes + tmp_bytes
    return int(min(max(2 * needed, 32 << 20), cap))


# ---------------------------------------------------------------------------
# Pallas wrapper.
# ---------------------------------------------------------------------------
def magnitude_scaling_pallas(x, feature_mask, *, lower_value=0.0,
                             upper_value=1.0):
    """Frequency-domain magnitude rescale of masked columns.

    x: (N, L) or (B, N, L) float32. A leading B axis is a batch of independent
       instances processed in one pallas_call (weights stay VMEM-resident,
       instance grid axis is 'parallel').
    feature_mask: (L,) or (1, L), 1.0 at the frequency columns to rescale.
    Returns complex64 with the same shape as x.
    """
    x = jnp.asarray(x, jnp.float32)
    squeeze = x.ndim == 2
    x3 = x[None] if squeeze else x
    b, n, length = x3.shape
    lp = _round_up(length, _LANE)

    w_fwd, w_inv_top, w_inv_bot = _dft_weights(length)
    mask = jnp.asarray(feature_mask, jnp.float32).reshape(-1)
    mask_p = jnp.zeros((1, lp), jnp.float32).at[0, :length].set(mask)

    kernel = functools.partial(_magnitude_scaling_kernel,
                               lower_value=float(lower_value),
                               upper_value=float(upper_value),
                               lp=lp)

    # Grid-invariant operands: constant index_map; single-buffer when the
    # installed jax supports it (double-buffering them only clones the
    # weights in VMEM).
    if _single_buffer_supported():
        def const_spec(shape):
            return pl.BlockSpec(shape, lambda i: (0,) * len(shape),
                                pipeline_mode=pl.Buffered(1))
    else:
        def const_spec(shape):
            return pl.BlockSpec(shape, lambda i: (0,) * len(shape))

    out = pl.pallas_call(
        kernel,
        out_shape=jax.ShapeDtypeStruct((b, n, 2 * lp), jnp.float32),
        grid=(b,),
        in_specs=[
            pl.BlockSpec((1, n, length), lambda i: (i, 0, 0)),     # x instance
            const_spec((length, 2 * lp)),                          # W_fwd
            const_spec((lp, 2 * lp)),                              # W_inv_top
            const_spec((lp, 2 * lp)),                              # W_inv_bot
            const_spec((1, lp)),                                   # mask
        ],
        out_specs=pl.BlockSpec((1, n, 2 * lp), lambda i: (i, 0, 0)),
        compiler_params=pltpu.CompilerParams(
            dimension_semantics=("parallel",),       # megacore-shard instances
            vmem_limit_bytes=_vmem_limit_bytes(n, length, lp)),
    )(x3, w_fwd, w_inv_top, w_inv_bot, mask_p)

    # Lane-aligned [re | im] slab -> complex64 (wrapper glue only).
    res = lax.complex(out[..., :length], out[..., lp:lp + length])
    return res[0] if squeeze else res


def magnitude_scaling(x, key, *, probability=1.0, lower_value=0.0,
                      upper_value=1.0, features=0):
    """Full module forward (jittable). Mirrors MagnitudeScaling.forward."""
    k_prob, k_feat = jax.random.split(key)
    u = jax.random.uniform(k_prob, ())
    length = x.shape[-1]
    feat_idx = jax.random.randint(k_feat, (features,), 0, length)
    # 0/1 column mask: torch rescales duplicate indices twice, but the second
    # pass maps [lower, upper] onto itself (idempotent), so one masked pass
    # over the original magnitudes is equivalent.
    mask = jnp.zeros((length,), jnp.float32).at[feat_idx].set(1.0)

    def _apply(xx):
        return magnitude_scaling_pallas(xx, mask, lower_value=lower_value,
                                        upper_value=upper_value)

    def _skip(xx):
        return xx.astype(jnp.complex64)

    return lax.cond(probability > u, _apply, _skip, x)


# ---------------------------------------------------------------------------
# Pure-JAX reference (mirrors the torch forward).
# ---------------------------------------------------------------------------
def _reference(x, mask, lower_value, upper_value):
    tr = jnp.fft.fft(x)
    mag = jnp.abs(tr)
    ph = jnp.angle(tr)
    cmin = jnp.min(mag, axis=0, keepdims=True)
    cmax = jnp.max(mag, axis=0, keepdims=True)
    scaled = (upper_value - lower_value) * (mag - cmin) / (cmax - cmin) + lower_value
    mask2 = jnp.asarray(mask, jnp.float32).reshape(1, -1)
    new_mag = jnp.where(mask2 > 0.0, scaled, mag)
    return jnp.fft.ifft(new_mag * jnp.exp(1j * ph))


if __name__ == "__main__":
    key = jax.random.PRNGKey(0)
    k_x, k_feat, k_rest = jax.random.split(key, 3)

    N, L = 8, 32          # small 2D input (batch, seq) as the module implies
    FEATURES = 4
    LOWER, UPPER = 0.0, 1.0

    x = jax.random.normal(k_x, (N, L), jnp.float32)

    # Deterministic feature-column mask (randint(0, L, (features,)))
    feat_idx = jax.random.randint(k_feat, (FEATURES,), 0, L)
    mask = jnp.zeros((1, L), jnp.float32).at[0, feat_idx].set(1.0)

    out = magnitude_scaling_pallas(x, mask, lower_value=LOWER, upper_value=UPPER)
    out = jax.block_until_ready(out)

    ref = _reference(x, mask, LOWER, UPPER)
    assert out.shape == (N, L) and out.dtype == jnp.complex64
    # bf16 MXU operands: DFT roundoff grows ~sqrt(L)*2^-9, fine at L=32.
    assert bool(jnp.allclose(out, ref, atol=2e-2, rtol=2e-2))

    # Batched-instance path: grid over instances, weights VMEM-resident.
    B = 2
    xb = jax.random.normal(k_rest, (B, N, L), jnp.float32)
    outb = jax.block_until_ready(
        magnitude_scaling_pallas(xb, mask, lower_value=LOWER, upper_value=UPPER))
    refb = jnp.stack([_reference(xb[i], mask, LOWER, UPPER) for i in range(B)])
    assert outb.shape == (B, N, L) and outb.dtype == jnp.complex64
    assert bool(jnp.allclose(outb, refb, atol=2e-2, rtol=2e-2))

    # Jittable full forward: probability branch via lax.cond (no host sync).
    fwd = jax.jit(functools.partial(magnitude_scaling, probability=1.0,
                                    lower_value=LOWER, upper_value=UPPER,
                                    features=FEATURES))
    out2 = jax.block_until_ready(fwd(x, k_rest))
    assert out2.shape == (N, L) and out2.dtype == jnp.complex64
    assert bool(jnp.all(jnp.isfinite(out2.real)) & jnp.all(jnp.isfinite(out2.imag)))

    print("KERNEL_OK")
</pallas_src>

<mosaic_0001>
module attributes {stable_mosaic.version = 11 : i64} {
  func.func @_copy(%arg0: i32, %arg1: memref<8x128xf32, #tpu.memory_space<vmem>>, %arg2: memref<8x128xf32, #tpu.memory_space<vmem>>) attributes {dimension_semantics = [#tpu.dimension_semantics<arbitrary>], iteration_bounds = array<i64: 1>, scalar_prefetch = 0 : i64, scratch_operands = 0 : i64, tpu.core_type = #tpu.core_type<tc>, window_params = [{pipeline_mode = #tpu.pipeline_mode<synchronous>, transform_indices = @transform_0, window_bounds = array<i64: 8, 128>}, {pipeline_mode = #tpu.pipeline_mode<synchronous>, transform_indices = @transform_1, window_bounds = array<i64: 8, 128>}]} {
    %c0 = arith.constant 0 : index
    %c0_0 = arith.constant 0 : index
    %0 = vector.load %arg1[%c0, %c0_0] : memref<8x128xf32, #tpu.memory_space<vmem>>, vector<8x128xf32>
    %c0_1 = arith.constant 0 : index
    %c0_2 = arith.constant 0 : index
    %1 = vector.load %arg2[%c0_1, %c0_2] : memref<8x128xf32, #tpu.memory_space<vmem>>, vector<8x128xf32>
    tpu.vector_store %arg2[%c0_1, %c0_2], %0 {strides = array<i32>} : memref<8x128xf32, #tpu.memory_space<vmem>>, vector<8x128xf32>,
    return
  }
  func.func @transform_0(%arg0: i32) -> (i32, i32) {
    %c0_i32 = arith.constant 0 : i32
    %c0_i32_0 = arith.constant 0 : i32
    %c0_i32_1 = arith.constant 0 : i32
    return %c0_i32, %c0_i32_0 : i32, i32
  }
  func.func @transform_1(%arg0: i32) -> (i32, i32) {
    %c0_i32 = arith.constant 0 : i32
    %c0_i32_0 = arith.constant 0 : i32
    %c0_i32_1 = arith.constant 0 : i32
    return %c0_i32, %c0_i32_0 : i32, i32
  }
}

module attributes {stable_mosaic.version = 11 : i64} {
  func.func @_magnitude_scaling_kernel(%arg0: i32, %arg1: memref<1x8x32xf32, #tpu.memory_space<vmem>>, %arg2: memref<32x256xbf16, #tpu.memory_space<vmem>>, %arg3: memref<128x256xbf16, #tpu.memory_space<vmem>>, %arg4: memref<128x256xbf16, #tpu.memory_space<vmem>>, %arg5: memref<1x128xf32, #tpu.memory_space<vmem>>, %arg6: memref<1x8x256xf32, #tpu.memory_space<vmem>>) attributes {dimension_semantics = [#tpu.dimension_semantics<parallel>], iteration_bounds = array<i64: 1>, scalar_prefetch = 0 : i64, scratch_operands = 0 : i64, tpu.core_type = #tpu.core_type<tc>, window_params = [{transform_indices = @transform_0, window_bounds = array<i64: 1, 8, 32>}, {pipeline_mode = #tpu.pipeline_mode<synchronous>, transform_indices = @transform_1, window_bounds = array<i64: 32, 256>}, {pipeline_mode = #tpu.pipeline_mode<synchronous>, transform_indices = @transform_2, window_bounds = array<i64: 128, 256>}, {pipeline_mode = #tpu.pipeline_mode<synchronous>, transform_indices = @transform_3, window_bounds = array<i64: 128, 256>}, {pipeline_mode = #tpu.pipeline_mode<synchronous>, transform_indices = @transform_4, window_bounds = array<i64: 1, 128>}, {transform_indices = @transform_5, window_bounds = array<i64: 1, 8, 256>}]} {
    %c0 = arith.constant 0 : index
    %c0_0 = arith.constant 0 : index
    %c0_1 = arith.constant 0 : index
    %0 = vector.load %arg1[%c0, %c0_0, %c0_1] : memref<1x8x32xf32, #tpu.memory_space<vmem>>, vector<1x8x32xf32>
    %1 = vector.shape_cast %0 : vector<1x8x32xf32> to vector<8x32xf32>
    %2 = arith.truncf %1 : vector<8x32xf32> to vector<8x32xbf16>
    %c0_2 = arith.constant 0 : index
    %c0_3 = arith.constant 0 : index
    %3 = vector.load %arg2[%c0_2, %c0_3] : memref<32x256xbf16, #tpu.memory_space<vmem>>, vector<32x256xbf16>
    %cst = arith.constant dense<0.000000e+00> : vector<8x256xf32>
    %4 = tpu.matmul %2, %3, %cst {dimension_numbers = #tpu.dot_dimension_numbers<[1], [0], [0], [1], [0, 0, 1, 1], [], []>} : vector<8x32xbf16>, vector<32x256xbf16>, vector<8x256xf32> -> vector<8x256xf32>
    %5 = vector.extract_strided_slice %4 {offsets = [0, 0], sizes = [8, 128], strides = [1, 1]} : vector<8x256xf32> to vector<8x128xf32>
    %6 = vector.extract_strided_slice %4 {offsets = [0, 128], sizes = [8, 128], strides = [1, 1]} : vector<8x256xf32> to vector<8x128xf32>
    %7 = arith.mulf %5, %5 : vector<8x128xf32>
    %8 = arith.mulf %6, %6 : vector<8x128xf32>
    %9 = arith.addf %7, %8 : vector<8x128xf32>
    %cst_4 = arith.constant 0.000000e+00 : f32
    %10 = vector.broadcast %cst_4 : f32 to vector<8x128xf32>
    %11 = arith.cmpf oeq, %9, %10 : vector<8x128xf32>
    %cst_5 = arith.constant 1.000000e+00 : f32
    %12 = vector.broadcast %cst_5 : f32 to vector<8x128xf32>
    %13 = arith.select %11, %12, %9 : vector<8x128xi1>, vector<8x128xf32>
    %14 = math.rsqrt %13 : vector<8x128xf32>
    %15 = arith.mulf %9, %14 : vector<8x128xf32>
    %cst_6 = arith.constant dense<0x7F800000> : vector<128xf32>
    %16 = vector.multi_reduction <minimumf>, %15, %cst_6 [0] : vector<8x128xf32> to vector<128xf32>
    %17 = vector.shape_cast %16 : vector<128xf32> to vector<1x128xf32>
    %cst_7 = arith.constant dense<0xFF800000> : vector<128xf32>
    %18 = vector.multi_reduction <maximumf>, %15, %cst_7 [0] : vector<8x128xf32> to vector<128xf32>
    %19 = vector.shape_cast %18 : vector<128xf32> to vector<1x128xf32>
    %20 = arith.subf %19, %17 : vector<1x128xf32>
    %cst_8 = arith.constant 0.000000e+00 : f32
    %21 = vector.broadcast %cst_8 : f32 to vector<1x128xf32>
    %22 = arith.cmpf oeq, %20, %21 : vector<1x128xf32>
    %cst_9 = arith.constant 1.000000e+00 : f32
    %23 = vector.broadcast %cst_9 : f32 to vector<1x128xf32>
    %24 = arith.select %22, %23, %20 : vector<1x128xi1>, vector<1x128xf32>
    %25 = tpu.reciprocal %24 {approx = true} : vector<1x128xf32> -> vector<1x128xf32>
    %26 = vector.broadcast %17 : vector<1x128xf32> to vector<8x128xf32>
    %27 = arith.subf %15, %26 : vector<8x128xf32>
    %cst_10 = arith.constant 1.000000e+00 : f32
    %28 = vector.broadcast %cst_10 : f32 to vector<8x128xf32>
    %29 = arith.mulf %28, %27 : vector<8x128xf32>
    %30 = vector.broadcast %25 : vector<1x128xf32> to vector<8x128xf32>
    %31 = arith.mulf %29, %30 : vector<8x128xf32>
    %cst_11 = arith.constant 0.000000e+00 : f32
    %32 = vector.broadcast %cst_11 : f32 to vector<8x128xf32>
    %33 = arith.addf %31, %32 : vector<8x128xf32>
    %c0_12 = arith.constant 0 : index
    %c0_13 = arith.constant 0 : index
    %34 = vector.load %arg5[%c0_12, %c0_13] : memref<1x128xf32, #tpu.memory_space<vmem>>, vector<1x128xf32>
    %cst_14 = arith.constant 0.000000e+00 : f32
    %35 = vector.broadcast %cst_14 : f32 to vector<1x128xf32>
    %36 = arith.cmpf ogt, %34, %35 : vector<1x128xf32>
    %37 = vector.shape_cast %36 : vector<1x128xi1> to vector<1x128xi1>
    %38 = vector.broadcast %37 : vector<1x128xi1> to vector<8x128xi1>
    %39 = arith.select %38, %33, %15 : vector<8x128xi1>, vector<8x128xf32>
    %40 = arith.mulf %39, %14 : vector<8x128xf32>
    %41 = arith.mulf %40, %5 : vector<8x128xf32>
    %42 = arith.select %11, %39, %41 : vector<8x128xi1>, vector<8x128xf32>
    %43 = arith.mulf %40, %6 : vector<8x128xf32>
    %cst_15 = arith.constant 0.000000e+00 : f32
    %44 = vector.broadcast %cst_15 : f32 to vector<8x128xf32>
    %45 = arith.select %11, %44, %43 : vector<8x128xi1>, vector<8x128xf32>
    %46 = arith.truncf %42 : vector<8x128xf32> to vector<8x128xbf16>
    %c0_16 = arith.constant 0 : index
    %c0_17 = arith.constant 0 : index
    %47 = vector.load %arg3[%c0_16, %c0_17] : memref<128x256xbf16, #tpu.memory_space<vmem>>, vector<128x256xbf16>
    %cst_18 = arith.constant dense<0.000000e+00> : vector<8x256xf32>
    %48 = tpu.matmul %46, %47, %cst_18 {dimension_numbers = #tpu.dot_dimension_numbers<[1], [0], [0], [1], [0, 0, 1, 1], [], []>} : vector<8x128xbf16>, vector<128x256xbf16>, vector<8x256xf32> -> vector<8x256xf32>
    %49 = arith.truncf %45 : vector<8x128xf32> to vector<8x128xbf16>
    %c0_19 = arith.constant 0 : index
    %c0_20 = arith.constant 0 : index
    %50 = vector.load %arg4[%c0_19, %c0_20] : memref<128x256xbf16, #tpu.memory_space<vmem>>, vector<128x256xbf16>
    %cst_21 = arith.constant dense<0.000000e+00> : vector<8x256xf32>
    %51 = tpu.matmul %49, %50, %cst_21 {dimension_numbers = #tpu.dot_dimension_numbers<[1], [0], [0], [1], [0, 0, 1, 1], [], []>} : vector<8x128xbf16>, vector<128x256xbf16>, vector<8x256xf32> -> vector<8x256xf32>
    %52 = arith.addf %48, %51 : vector<8x256xf32>
    %c0_22 = arith.constant 0 : index
    %c0_23 = arith.constant 0 : index
    %c0_24 = arith.constant 0 : index
    %53 = vector.load %arg6[%c0_22, %c0_23, %c0_24] : memref<1x8x256xf32, #tpu.memory_space<vmem>>, vector<1x8x256xf32>
    %54 = vector.shape_cast %53 : vector<1x8x256xf32> to vector<8x256xf32>
    %55 = vector.shape_cast %52 : vector<8x256xf32> to vector<1x8x256xf32>
    tpu.vector_store %arg6[%c0_22, %c0_23, %c0_24], %55 {strides = array<i32>} : memref<1x8x256xf32, #tpu.memory_space<vmem>>, vector<1x8x256xf32>,
    return
  }
  func.func @transform_0(%arg0: i32) -> (i32, i32, i32) {
    %c0_i32 = arith.constant 0 : i32
    %c0_i32_0 = arith.constant 0 : i32
    %c0_i32_1 = arith.constant 0 : i32
    return %arg0, %c0_i32, %c0_i32_0 : i32, i32, i32
  }
  func.func @transform_1(%arg0: i32) -> (i32, i32) {
    %c0_i32 = arith.constant 0 : i32
    %c0_i32_0 = arith.constant 0 : i32
    %c0_i32_1 = arith.constant 0 : i32
    return %c0_i32, %c0_i32_0 : i32, i32
  }
  func.func @transform_2(%arg0: i32) -> (i32, i32) {
    %c0_i32 = arith.constant 0 : i32
    %c0_i32_0 = arith.constant 0 : i32
    %c0_i32_1 = arith.constant 0 : i32
    return %c0_i32, %c0_i32_0 : i32, i32
  }
  func.func @transform_3(%arg0: i32) -> (i32, i32) {
    %c0_i32 = arith.constant 0 : i32
    %c0_i32_0 = arith.constant 0 : i32
    %c0_i32_1 = arith.constant 0 : i32
    return %c0_i32, %c0_i32_0 : i32, i32
  }
  func.func @transform_4(%arg0: i32) -> (i32, i32) {
    %c0_i32 = arith.constant 0 : i32
    %c0_i32_0 = arith.constant 0 : i32
    %c0_i32_1 = arith.constant 0 : i32
    return %c0_i32, %c0_i32_0 : i32, i32
  }
  func.func @transform_5(%arg0: i32) -> (i32, i32, i32) {
    %c0_i32 = arith.constant 0 : i32
    %c0_i32_0 = arith.constant 0 : i32
    %c0_i32_1 = arith.constant 0 : i32
    return %arg0, %c0_i32, %c0_i32_0 : i32, i32, i32
  }
}

</mosaic_0001>

<bundles_post_ra>
// kernel: tpu_custom_call.1
= control target key start
LH: loop header
LB: loop body
LE: loop exit
PB: predicated region body
PF: predicated region fallthrough
CT: control target
= control target key end

     0   :  { %6 = vsyncpa [#allocation3], 0  ;;  %s124_s0 = inlined_call_operand.hbm [shape: f32[8,128], index: 0, kind: input, shape index: {}]   ;;  %s125_s1 = inlined_call_operand.hbm [shape: f32[8,128], index: 1, kind: output, shape index: {}]  }
   0x1   :  { %7 = vsyncpa [#allocation4], 0  ;;  %s88_s6 = smov [#allocation2]   ;;  %s40_s10 = scalar_lea.hbm %s124_s0, 128 }
   0x2   :  { %s14_s7 = sshll.u32 %s88_s6, 4  ;;  %p41_p0 = scmp.ne.s32.totalorder %s124_s0, %s40_s10  ;;  %s15_s7 = int_to_ptr.vmem [resolvable:$true] %s14_s7 }
   0x3   :  { %p44_p1 = scmp.lt.u32.totalorder %s40_s10, %s124_s0 }
   0x5   :  { %p46_p2 = pnand %p44_p1, %p41_p0 }
   0x7   :  { %49 = shalt.err (!%p46_p2)
}
   0x8   :  { %s50_s15 = scalar_lea.vmem %s15_s7, 128  ;;  %p55_p4 = scmp.lt.s32.totalorder %s15_s7, %s15_s7 }
   0x9   :  { %p51_p3 = scmp.ne.s32.totalorder %s15_s7, %s50_s15  ;;  %p56_p5 = scmp.lt.s32.totalorder %s50_s15, %s50_s15 }
   0xb   :  { %p57_p6 = por %p56_p5, %p55_p4 }
   0xd   :  { %p58_p7 = pnand %p57_p6, %p51_p3 }
   0xf   :  { %61 = shalt.err (!%p58_p7)
}
  0x10   :  { %17 = dma.hbm_to_vmem [thread:$0]  %s124_s0, 128, %s15_s7, [#allocation3]  }
  0x11   :  { %84 = dma.done.wait [#allocation3], 128  }
  0x12   :  { %85 = vsyncadd [#allocation3], 4294967168  ;;  %s89_s18 = smov [#allocation5]   ;;  %v21_v0 = vld [vmem:[#allocation2] sm:$0xff] }
  0x13   :  { %s29_s19 = sshll.u32 %s89_s18, 4  ;;  %22 = vst [vmem:[#allocation5] sm:$0xff] %v21_v0  ;;  %s30_s19 = int_to_ptr.vmem [resolvable:$true] %s29_s19 }
  0x14   :  { %s62_s20 = scalar_lea.vmem %s30_s19, 128  ;;  %p67_p9 = scmp.lt.s32.totalorder %s30_s19, %s30_s19 }
  0x15   :  { %p63_p8 = scmp.ne.s32.totalorder %s30_s19, %s62_s20  ;;  %p68_p10 = scmp.lt.s32.totalorder %s62_s20, %s62_s20 }
  0x17   :  { %p69_p11 = por %p68_p10, %p67_p9 }
  0x19   :  { %p70_p12 = pnand %p69_p11, %p63_p8 }
  0x1b   :  { %73 = shalt.err (!%p70_p12)
}
  0x1c   :  { %s74_s23 = scalar_lea.hbm %s125_s1, 128 }
  0x1d   :  { %p75_p13 = scmp.ne.s32.totalorder %s125_s1, %s74_s23  ;;  %p78_p0 = scmp.lt.u32.totalorder %s74_s23, %s125_s1 }
  0x1f   :  { %p80_p1 = pnand %p78_p0, %p75_p13 }
  0x21   :  { %83 = shalt.err (!%p80_p1)
}
  0x22   :  { %32 = dma.vmem_to_hbm [thread:$0]  %s30_s19, 128, %s125_s1, [#allocation4]  }
  0x23   :  { %86 = dma.done.wait [#allocation4], 128  }
  0x24   :  { %87 = vsyncadd [#allocation4], 4294967168 }
  0x25   :  { %36 = vsyncpa [#allocation3], 1 }
  0x26   :  { %37 = vsyncpa [#allocation4], 1 }

// kernel: tpu_custom_call.1
= control target key start
LH: loop header
LB: loop body
LE: loop exit
PB: predicated region body
PF: predicated region fallthrough
CT: control target
= control target key end

     0   :  { %10 = vsyncpa [#allocation3], 0  ;;  %s826_s0 = inlined_call_operand.hbm [shape: f32[1,8,32], index: 0, kind: input, shape index: {}]   ;;  %s827_s1 = inlined_call_operand.hbm [shape: bf16[32,256], index: 1, kind: input, shape index: {}]   ;;  %s828_s2 = inlined_call_operand.hbm [shape: bf16[128,256], index: 2, kind: input, shape index: {}]   ;;  %s829_s3 = inlined_call_operand.hbm [shape: bf16[128,256], index: 3, kind: input, shape index: {}]   ;;  %s830_s4 = inlined_call_operand.vmem [shape: f32[1,128], index: 4, kind: input, shape index: {}]   ;;  %s831_s5 = inlined_call_operand.hbm [shape: f32[1,8,256], index: 5, kind: output, shape index: {}]  }
   0x1   :  { %11 = vsyncpa [#allocation6], 0 }
   0x2   :  { %12 = vsyncpa [#allocation9], 0 }
   0x3   :  { %13 = vsyncpa [#allocation4], 0  ;;  %s709_s18 = smov [#allocation5]   ;;  %s591_s22 = scalar_lea.hbm %s827_s1, 512 }
   0x4   :  { %s29_s19 = sshll.u32 %s709_s18, 4  ;;  %p592_p0 = scmp.ne.s32.totalorder %s827_s1, %s591_s22  ;;  %s30_s19 = int_to_ptr.vmem [resolvable:$true] %s29_s19 }
   0x5   :  { %p595_p1 = scmp.lt.u32.totalorder %s591_s22, %s827_s1 }
   0x7   :  { %p597_p2 = pnand %p595_p1, %p592_p0 }
   0x9   :  { %600 = shalt.err (!%p597_p2)
}
   0xa   :  { %s601_s27 = scalar_lea.vmem %s30_s19, 512  ;;  %p606_p4 = scmp.lt.s32.totalorder %s30_s19, %s30_s19 }
   0xb   :  { %p602_p3 = scmp.ne.s32.totalorder %s30_s19, %s601_s27  ;;  %p607_p5 = scmp.lt.s32.totalorder %s601_s27, %s601_s27 }
   0xd   :  { %p608_p6 = por %p607_p5, %p606_p4 }
   0xf   :  { %p609_p7 = pnand %p608_p6, %p602_p3 }
  0x11   :  { %612 = shalt.err (!%p609_p7)
}
  0x12   :  { %s710_s28 = smov 128   ;;  %s711_s29 = smov 8  }
  0x13   :  { %35 = dma.hbm_to_vmem [thread:$0]  %s827_s1, 512, %s30_s19, [#allocation6], %s710_s28, %s710_s28, %s711_s29  }
  0x14   :  { %s712_s7 = smov [#allocation2]   ;;  %s713_s9 = smov [#allocation7]  }
  0x15   :  { %s20_s8 = sshll.u32 %s712_s7, 4  ;;  %s41_s10 = sshll.u32 %s713_s9, 4  ;;  %s21_s8 = int_to_ptr.vmem [resolvable:$true] %s20_s8  ;;  %s42_s10 = int_to_ptr.vmem [resolvable:$true] %s41_s10 }
  0x16   :  { %s613_s13 = scalar_lea.hbm %s826_s0, 128 }
  0x17   :  { %p614_p8 = scmp.ne.s32.totalorder %s826_s0, %s613_s13  ;;  %p617_p9 = scmp.lt.u32.totalorder %s613_s13, %s826_s0 }
  0x19   :  { %p619_p10 = pnand %p617_p9, %p614_p8 }
  0x1b   :  { %622 = shalt.err (!%p619_p10)
}
  0x1c   :  { %s623_s1 = scalar_lea.vmem %s21_s8, 128  ;;  %p628_p12 = scmp.lt.s32.totalorder %s21_s8, %s21_s8 }
  0x1d   :  { %p624_p11 = scmp.ne.s32.totalorder %s21_s8, %s623_s1  ;;  %p629_p13 = scmp.lt.s32.totalorder %s623_s1, %s623_s1 }
  0x1f   :  { %p630_p0 = por %p629_p13, %p628_p12 }
  0x21   :  { %p631_p1 = pnand %p630_p0, %p624_p11 }
  0x23   :  { %634 = shalt.err (!%p631_p1)
}
  0x24   :  { %23 = dma.hbm_to_vmem [thread:$0]  %s826_s0, 128, %s21_s8, [#allocation3]  }
  0x25   :  { %s635_s22 = scalar_lea.hbm %s828_s2, 2048 }
  0x26   :  { %p636_p2 = scmp.ne.s32.totalorder %s828_s2, %s635_s22  ;;  %p639_p3 = scmp.lt.u32.totalorder %s635_s22, %s828_s2 }
  0x28   :  { %p641_p4 = pnand %p639_p3, %p636_p2 }
  0x2a   :  { %644 = shalt.err (!%p641_p4)
}
  0x2b   :  { %s645_s27 = scalar_lea.vmem %s42_s10, 2048  ;;  %p650_p6 = scmp.lt.s32.totalorder %s42_s10, %s42_s10 }
  0x2c   :  { %p646_p5 = scmp.ne.s32.totalorder %s42_s10, %s645_s27  ;;  %p651_p7 = scmp.lt.s32.totalorder %s645_s27, %s645_s27 }
  0x2e   :  { %p652_p8 = por %p651_p7, %p650_p6 }
  0x30   :  { %p653_p9 = pnand %p652_p8, %p646_p5 }
  0x32   :  { %656 = shalt.err (!%p653_p9)
}
  0x33   :  { %47 = dma.hbm_to_vmem [thread:$0]  %s828_s2, 2048, %s42_s10, [#allocation6], %s710_s28, %s710_s28, %s711_s29  }
  0x34   :  { %s714_s6 = smov [#allocation8]   ;;  %s657_s11 = scalar_lea.hbm %s829_s3, 2048 }
  0x35   :  { %s53_s7 = sshll.u32 %s714_s6, 4  ;;  %p658_p10 = scmp.ne.s32.totalorder %s829_s3, %s657_s11  ;;  %s54_s7 = int_to_ptr.vmem [resolvable:$true] %s53_s7 }
  0x36   :  { %p661_p11 = scmp.lt.u32.totalorder %s657_s11, %s829_s3 }
  0x38   :  { %p663_p12 = pnand %p661_p11, %p658_p10 }
  0x3a   :  { %666 = shalt.err (!%p663_p12)
}
  0x3b   :  { %s667_s16 = scalar_lea.vmem %s54_s7, 2048  ;;  %p672_p0 = scmp.lt.s32.totalorder %s54_s7, %s54_s7 }
  0x3c   :  { %p668_p13 = scmp.ne.s32.totalorder %s54_s7, %s667_s16  ;;  %p673_p1 = scmp.lt.s32.totalorder %s667_s16, %s667_s16 }
  0x3e   :  { %p674_p2 = por %p673_p1, %p672_p0 }
  0x40   :  { %p675_p3 = pnand %p674_p2, %p668_p13 }
  0x42   :  { %678 = shalt.err (!%p675_p3)
}
  0x43   :  { %59 = dma.hbm_to_vmem [thread:$0]  %s829_s3, 2048, %s54_s7, [#allocation9], %s710_s28, %s710_s28, %s711_s29  }
  0x44   :  { %701 = dma.done.wait [#allocation3], 128  }
  0x45   :  { %702 = vsyncadd [#allocation3], 4294967168 }
  0x46   :  { %703 = dma.done.wait [#allocation6], 2560  }
  0x47   :  { %704 = vsyncadd [#allocation6], 4294964736 }
  0x48   :  { %705 = dma.done.wait [#allocation9], 2048  }
  0x49   :  { %706 = vsyncadd [#allocation9], 4294965248  ;;  %v715_v0 = vmov 0   ;;  %v533_v1 = vld [vmem:[#allocation5 + $0x4] ss:$8 sps:$4 sm:$0xff]   ;;  %v75_v5 = vld [vmem:[#allocation2] sm:$0xff]  ;;  %v175_v60 = vlaneseq }
  0x4a   :  { %137 = vmatprep.mubr.bf16.mxu0 %v715_v0  ;;  %453 = vmatprep.mubr.bf16.mxu1 %v715_v0  ;;  %v535_v2 = vld [vmem:[#allocation5] ss:$8 sps:$4 sm:$0xff]   ;;  %v536_v3 = vld [vmem:[#allocation5 + $0x14] ss:$8 sps:$4 sm:$0xff]   ;;  %v538_v4 = vld [vmem:[#allocation5 + $0x10] ss:$8 sps:$4 sm:$0xff]   ;;  %v76_v6 = vpack.c.bf16 %v75_v5, %v75_v5 }
  0x4b   :  { %105 = vmatprep.subr.bf16.mxu0 %v533_v1  ;;  %vm101_vm0 = vcmask 261120   ;;  %v541_v7 = vld [vmem:[#allocation8 + $0x4] ss:$8 sps:$4 sm:$0xff]   ;;  %v539_v8 = vld [vmem:[#allocation8] ss:$8 sps:$4 sm:$0xff]   ;;  %v176_v63 = vshrl.u32 %v175_v60, 7 }
  0x4c   :  { %106 = vmatpush1.bf16.msra.mxu0 %v535_v2  ;;  %v542_v9 = vld [vmem:[#allocation7 + $0x4] ss:$8 sps:$4 sm:$0xff]   ;;  %v544_v10 = vld [vmem:[#allocation7] ss:$8 sps:$4 sm:$0xff]   ;;  %v547_v11 = vld [vmem:[#allocation8 + $0x14] ss:$8 sps:$4 sm:$0xff]  }
  0x4d   :  { %107 = vmatprep.subr.bf16.mxu0 %v536_v3  ;;  %421 = vmatprep.subr.bf16.mxu1 %v542_v9  ;;  %v545_v12 = vld [vmem:[#allocation8 + $0x10] ss:$8 sps:$4 sm:$0xff]   ;;  %v548_v13 = vld [vmem:[#allocation7 + $0x14] ss:$8 sps:$4 sm:$0xff]   ;;  %v553_v15 = vld [vmem:[#allocation8 + $0x24] ss:$8 sps:$4 sm:$0xff]  }
  0x4e   :  { %422 = vmatpush1.bf16.msra.mxu1 %v544_v10  ;;  %v550_v14 = vld [vmem:[#allocation7 + $0x10] ss:$8 sps:$4 sm:$0xff]   ;;  %v551_v16 = vld [vmem:[#allocation8 + $0x20] ss:$8 sps:$4 sm:$0xff]   ;;  %v554_v17 = vld [vmem:[#allocation7 + $0x24] ss:$8 sps:$4 sm:$0xff]  }
  0x4f   :  { %423 = vmatprep.subr.bf16.mxu1 %v548_v13  ;;  %v556_v18 = vld [vmem:[#allocation7 + $0x20] ss:$8 sps:$4 sm:$0xff]   ;;  %v559_v19 = vld [vmem:[#allocation8 + $0x34] ss:$8 sps:$4 sm:$0xff]   ;;  %v557_v20 = vld [vmem:[#allocation8 + $0x30] ss:$8 sps:$4 sm:$0xff]  }
  0x50   :  { %108 = vmatpush1.bf16.msra.mxu0 %v538_v4  ;;  %v560_v21 = vld [vmem:[#allocation7 + $0x34] ss:$8 sps:$4 sm:$0xff]   ;;  %v562_v22 = vld [vmem:[#allocation7 + $0x30] ss:$8 sps:$4 sm:$0xff]   ;;  %v565_v23 = vld [vmem:[#allocation8 + $0x44] ss:$8 sps:$4 sm:$0xff]  }
  0x51   :  { %300 = vmatprep.subr.bf16.mxu0 %v541_v7  ;;  %v563_v24 = vld [vmem:[#allocation8 + $0x40] ss:$8 sps:$4 sm:$0xff]   ;;  %v566_v25 = vld [vmem:[#allocation7 + $0x44] ss:$8 sps:$4 sm:$0xff]   ;;  %v571_v27 = vld [vmem:[#allocation8 + $0x54] ss:$8 sps:$4 sm:$0xff]  }
  0x52   :  { %424 = vmatpush1.bf16.msra.mxu1 %v550_v14  ;;  %v568_v26 = vld [vmem:[#allocation7 + $0x40] ss:$8 sps:$4 sm:$0xff]   ;;  %v569_v28 = vld [vmem:[#allocation8 + $0x50] ss:$8 sps:$4 sm:$0xff]   ;;  %v572_v29 = vld [vmem:[#allocation7 + $0x54] ss:$8 sps:$4 sm:$0xff]  }
  0x53   :  { %485 = vmatmul.mubr.msk.bf16.vlgmr.msra.gmra.mrb[0].mxu0 %vm101_vm0, %v76_v6  ;;  %425 = vmatprep.subr.bf16.mxu1 %v554_v17  ;;  %v574_v30 = vld [vmem:[#allocation7 + $0x50] ss:$8 sps:$4 sm:$0xff]   ;;  %v577_v31 = vld [vmem:[#allocation8 + $0x64] ss:$8 sps:$4 sm:$0xff]   ;;  %v575_v32 = vld [vmem:[#allocation8 + $0x60] ss:$8 sps:$4 sm:$0xff]  }
  0x54   :  { %332 = vmatprep.mubr.bf16.mxu0 %v715_v0  ;;  %301 = vmatpush1.bf16.msra.mxu0 %v539_v8  ;;  %v578_v33 = vld [vmem:[#allocation7 + $0x64] ss:$8 sps:$4 sm:$0xff]   ;;  %v580_v34 = vld [vmem:[#allocation7 + $0x60] ss:$8 sps:$4 sm:$0xff]   ;;  %v583_v35 = vld [vmem:[#allocation8 + $0x74] ss:$8 sps:$4 sm:$0xff]  }
  0x55   :  { %302 = vmatprep.subr.bf16.mxu0 %v547_v11  ;;  %v581_v36 = vld [vmem:[#allocation8 + $0x70] ss:$8 sps:$4 sm:$0xff]   ;;  %v584_v37 = vld [vmem:[#allocation7 + $0x74] ss:$8 sps:$4 sm:$0xff]   ;;  %v177_v2 = vsub.s32 0, %v176_v63 }
  0x56   :  { %426 = vmatpush1.bf16.msra.mxu1 %v556_v18  ;;  %v586_v38 = vld [vmem:[#allocation7 + $0x70] ss:$8 sps:$4 sm:$0xff]  }
  0x57   :  { %427 = vmatprep.subr.bf16.mxu1 %v560_v21  ;;  %v172_v62 = vld [vmem:[%s830_s4] sm:$0x1]  ;;  %s716_s4 = smov [#allocation10]  }
  0x58   :  { %303 = vmatpush1.bf16.msra.mxu0 %v545_v12  ;;  %vm173_vm3 = vcmp.gt.f32.partialorder %v172_v62, 0.0  ;;  %s470_s29 = sshll.u32 %s716_s4, 4  ;;  %s471_s29 = int_to_ptr.vmem [resolvable:$true] %s470_s29 }
  0x59   :  { %304 = vmatprep.subr.bf16.mxu0 %v553_v15  ;;  %v174_v3 = vsel %vm173_vm3, 1, %v715_v0  ;;  %s679_s17 = scalar_lea.vmem %s471_s29, 256  ;;  %p684_p5 = scmp.lt.s32.totalorder %s471_s29, %s471_s29 }
  0x5a   :  { %428 = vmatpush1.bf16.msra.mxu1 %v562_v22  ;;  %v178_v4 = vrot.slane %v174_v3, %v177_v2  ;;  %p680_p4 = scmp.ne.s32.totalorder %s471_s29, %s679_s17  ;;  %p685_p6 = scmp.lt.s32.totalorder %s679_s17, %s679_s17 }
  0x5b   :  { %429 = vmatprep.subr.bf16.mxu1 %v566_v25 }
  0x5c   :  { %305 = vmatpush1.bf16.msra.mxu0 %v551_v16  ;;  %vm179_vm4 = vcmp.eq.s32.totalorder %v178_v4, 1  ;;  %p686_p7 = por %p685_p6, %p684_p5 }
  0x5d   :  { %306 = vmatprep.subr.bf16.mxu0 %v559_v19 }
  0x5e   :  { %430 = vmatpush1.bf16.msra.mxu1 %v568_v26  ;;  %p687_p8 = pnand %p686_p7, %p680_p4 }
  0x5f   :  { %431 = vmatprep.subr.bf16.mxu1 %v572_v29 }
  0x60   :  { %307 = vmatpush1.bf16.msra.mxu0 %v557_v20 }
  0x61   :  { %308 = vmatprep.subr.bf16.mxu0 %v565_v23 }
  0x62   :  { %432 = vmatpush1.bf16.msra.mxu1 %v574_v30 }
  0x63   :  { %433 = vmatprep.subr.bf16.mxu1 %v578_v33 }
  0x64   :  { %309 = vmatpush1.bf16.msra.mxu0 %v563_v24 }
  0x65   :  { %310 = vmatprep.subr.bf16.mxu0 %v571_v27 }
  0x66   :  { %434 = vmatpush1.bf16.msra.mxu1 %v580_v34 }
  0x67   :  { %435 = vmatprep.subr.bf16.mxu1 %v584_v37 }
  0x68   :  { %311 = vmatpush1.bf16.msra.mxu0 %v569_v28 }
  0x69   :  { %312 = vmatprep.subr.bf16.mxu0 %v577_v31 }
  0x6a   :  { %436 = vmatpush1.bf16.msra.mxu1 %v586_v38 }
  0x6c   :  { %313 = vmatpush1.bf16.msra.mxu0 %v575_v32 }
  0x6d   :  { %314 = vmatprep.subr.bf16.mxu0 %v583_v35 }
  0x70   :  { %315 = vmatpush1.bf16.msra.mxu0 %v581_v36 }
 0x126   :  { %v139_v39 = vpop.f32.mrb[0].mxu0 }
 0x127   :  { %v146_v40 = vmul.f32 %v139_v39, %v139_v39  ;;  %v141_v41 = vpop.f32.mrb[1].mxu0 }
 0x128   :  { %v147_v42 = vmul.f32 %v141_v41, %v141_v41  ;;  %v143_v43 = vpop.f32.mrb[2].mxu0 }
 0x129   :  { %v144_v44 = vpop.f32.mrb[3].mxu0 }
 0x12a   :  { %v148_v45 = vadd.f32 %v147_v42, %v146_v40 }
 0x12c   :  { %vm149_vm1 = vcmp.eq.f32.partialorder %v148_v45, 0.0 }
 0x12d   :  { %v150_v46 = vsel %vm149_vm1, 1.0, %v148_v45  ;;  %vm502_vm5 = vmneg %vm149_vm1 }
 0x12e   :  { %587 = vrsqrt.f32 %v150_v46  ;;  %vm504_vm6 = vmpackc.low %vm502_vm5, %vm502_vm5 }
 0x138   :  { %v588_v47 = vpop.eup %587 }
 0x139   :  { %v152_v48 = vmul.f32 %v588_v47, %v148_v45 }
 0x13b   :  { %v153_v49 = vrot.slane %v152_v48, 4 }
 0x13d   :  { %v154_v50 = vmin.f32 %v152_v48, %v153_v49  ;;  %v160_v51 = vmax.f32 %v152_v48, %v153_v49 }
 0x13f   :  { %v155_v52 = vrot.slane %v154_v50, 2  ;;  %v161_v53 = vrot.slane %v160_v51, 2 }
 0x141   :  { %v156_v54 = vmin.f32 %v154_v50, %v155_v52  ;;  %v162_v55 = vmax.f32 %v160_v51, %v161_v53 }
 0x143   :  { %v157_v56 = vrot.slane %v156_v54, 1  ;;  %v163_v57 = vrot.slane %v162_v55, 1 }
 0x145   :  { %v158_v58 = vmin.f32 %v156_v54, %v157_v56  ;;  %v164_v59 = vmax.f32 %v162_v55, %v163_v57 }
 0x147   :  { %v165_v61 = vsub.f32 %v164_v59, %v158_v58  ;;  %v169_v5 = vsub.f32 %v152_v48, %v158_v58 }
 0x149   :  { %vm166_vm2 = vcmp.eq.f32.partialorder %v165_v61, 0.0 }
 0x14a   :  { %v167_v1 = vsel %vm166_vm2, 1.0, %v165_v61 }
 0x14b   :  { %589 = vrcp.f32 %v167_v1 }
 0x155   :  { %v590_v6 = vpop.eup %589 }
 0x156   :  { %v170_v7 = vmul.f32 %v590_v6, %v169_v5 }
 0x158   :  { %v180_v8 = vsel %vm179_vm4, %v170_v7, %v152_v48 }
 0x159   :  { %v181_v9 = vmul.f32 %v588_v47, %v180_v8 }
 0x15b   :  { %v182_v10 = vmul.f32 %v181_v9, %v139_v39  ;;  %v184_v11 = vmul.f32 %v181_v9, %v141_v41 }
 0x15d   :  { %v505_v12 = vpack.c.bf16 %v184_v11, %v184_v11  ;;  %v183_v13 = vsel %vm149_vm1, %v180_v8, %v182_v10 }
 0x15e   :  { %v186_v14 = vpack.c.bf16 %v183_v13, %v183_v13 }
 0x15f   :  { %506 = vmatmul.mubr.msk.bf16.vlgmr.msra.gmra.mrb[4].mxu0 %vm504_vm6, %v505_v12 }
 0x160   :  { %454 = vmatmul.mubr.bf16.vlgmr.msra.gmra.mrb[0].mxu1 %v186_v14 }
 0x232   :  { %v334_v15 = vpop.f32.mrb[4].mxu0 }
 0x233   :  { %v336_v0 = vpop.f32.mrb[5].mxu0  ;;  %v455_v16 = vpop.f32.mrb[0].mxu1 }
 0x234   :  { %v456_v17 = vadd.f32 %v455_v16, %v334_v15  ;;  %v338_v18 = vpop.f32.mrb[6].mxu0  ;;  %v457_v19 = vpop.f32.mrb[1].mxu1 }
 0x235   :  { %v458_v20 = vadd.f32 %v457_v19, %v336_v0  ;;  %v339_v21 = vpop.f32.mrb[7].mxu0  ;;  %v459_v22 = vpop.f32.mrb[2].mxu1 }
 0x236   :  { %462 = vst [vmem:[#allocation10] sm:$0xff] %v456_v17  ;;  %v460_v23 = vpop.f32.mrb[3].mxu1 }
 0x237   :  { %463 = vst [vmem:[#allocation10 + $0x8] sm:$0xff] %v458_v20 }
 0x238   :  { %690 = shalt.err (!%p687_p8)
}
 0x239   :  { %s691_s19 = scalar_lea.hbm %s831_s5, 256 }
 0x23a   :  { %p692_p9 = scmp.ne.s32.totalorder %s831_s5, %s691_s19  ;;  %p695_p10 = scmp.lt.u32.totalorder %s691_s19, %s831_s5 }
 0x23c   :  { %p697_p11 = pnand %p695_p10, %p692_p9 }
 0x23e   :  { %700 = shalt.err (!%p697_p11)
}
 0x23f   :  { %473 = dma.vmem_to_hbm [thread:$0]  %s471_s29, 256, %s831_s5, [#allocation4]  }
 0x240   :  { %707 = dma.done.wait [#allocation4], 256  }
 0x241   :  { %708 = vsyncadd [#allocation4], 4294967040 }
 0x242   :  { %477 = vsyncpa [#allocation3], 1 }
 0x243   :  { %478 = vsyncpa [#allocation6], 1 }
 0x244   :  { %479 = vsyncpa [#allocation9], 1 }
 0x245   :  { %480 = vsyncpa [#allocation4], 1 }

</bundles_post_ra>
